<compile_context>
chip_gen: v6e
topology: v6e:2x2x1
jax: 0.10.0
libtpu: 0.0.40
codegen_flags: <defaults>
</compile_context>

<pallas_src>
import functools

import jax
import jax.numpy as jnp
from jax import lax
from jax.experimental import pallas as pl
from jax.experimental.pallas import tpu as pltpu


def _round_up(x, m):
    return (x + m - 1) // m * m


def _cdiv(a, b):
    return -(-a // b)


# ----------------------------- Pallas kernel --------------------------------
def _ppo_kernel(x_ref,
                w1_ref, aux1_ref,
                w2_ref, aux2_ref,
                wh_ref, bh_ref,
                out_ref, *, output_size):
    eps = 1e-5
    f32 = jnp.float32
    bf16 = jnp.bfloat16

    def linear_ln_relu(x, w_ref, aux_ref):
        b = aux_ref[0:1, :]
        g = aux_ref[1:2, :]
        beta = aux_ref[2:3, :]
        h = jnp.dot(x.astype(bf16), w_ref[...],
                    preferred_element_type=f32) + b
        # One-pass LN statistics: sum and sum-of-squares are independent XLU
        # reductions (no serialized mean -> subtract -> square -> mean chain).
        inv_n = 1.0 / h.shape[-1]
        s1 = jnp.sum(h, axis=-1, keepdims=True)
        s2 = jnp.sum(h * h, axis=-1, keepdims=True)
        mu = s1 * inv_n
        var = jnp.maximum(s2 * inv_n - mu * mu, 0.0)      # biased (PyTorch LN)
        h = (h - mu) * lax.rsqrt(var + eps) * g + beta
        return jnp.maximum(h, 0.0)

    # ---- feature: Linear(in,256)+LN+ReLU, Linear(256,128)+LN+ReLU ----
    h = linear_ln_relu(x_ref[...], w1_ref, aux1_ref)
    h = linear_ln_relu(h, w2_ref, aux2_ref)

    # ---- fused actor+critic head: one (128, head_width) matmul ----
    # cols [0, output_size)  = actor logits
    # col  output_size       = critic value
    # col  output_size + 1   = per-row "NaN in logits" flag (0.0 / 1.0)
    # remaining cols         = zero padding (zero weights / zero bias).
    z = jnp.dot(h.astype(bf16), wh_ref[...],
                preferred_element_type=f32) + bh_ref[...]

    col = lax.broadcasted_iota(jnp.int32, z.shape, dimension=1)
    is_logit = col < output_size
    masked = jnp.where(is_logit, z, -jnp.inf)

    # In-kernel stand-in for torch.isnan(logits).any(): per-row flag emitted
    # in the output slab; the caller checks it host-side and raises.
    nan_f = jnp.max(jnp.where(jnp.isnan(masked), 1.0, 0.0),
                    axis=-1, keepdims=True)

    # masked softmax over the logit columns only (stays 128-lane dense).
    m = jnp.max(masked, axis=-1, keepdims=True)
    e = jnp.exp(masked - m)                               # exactly 0 off-logits
    s = jnp.sum(e, axis=-1, keepdims=True)
    inv = pl.reciprocal(s, approx=True)                   # EUP slot
    inv = inv * (2.0 - s * inv)                           # Newton -> f32-accurate
    probs = e * inv

    slab = probs
    slab = jnp.where(col == output_size, z, slab)         # critic value column
    slab = jnp.where(col == output_size + 1, nan_f, slab) # NaN flag column
    out_ref[...] = slab                                   # single dense store


# --------------------------- one-time param packing ---------------------------
def pack_params(params):
    """Hoists all transposes/reshapes/casts out of the per-call hot path."""
    f32 = jnp.float32
    bf16 = jnp.bfloat16
    output_size = int(params["wa"].shape[0])
    head_width = max(128, _round_up(output_size + 2, 128))  # +1 value, +1 flag

    wh = jnp.zeros((128, head_width), f32)
    wh = wh.at[:, :output_size].set(params["wa"].T)
    wh = wh.at[:, output_size].set(params["wc"][0])
    bh = jnp.zeros((1, head_width), f32)
    bh = bh.at[0, :output_size].set(params["ba"])
    bh = bh.at[0, output_size].set(params["bc"][0])

    packed = {
        "w1": params["w1"].T.astype(bf16),                         # (in, 256)
        "aux1": jnp.stack([params["b1"], params["g1"],
                           params["beta1"]]).astype(f32),          # (3, 256)
        "w2": params["w2"].T.astype(bf16),                         # (256, 128)
        "aux2": jnp.stack([params["b2"], params["g2"],
                           params["beta2"]]).astype(f32),          # (3, 128)
        "wh": wh.astype(bf16),                                     # (128, hw)
        "bh": bh,                                                  # (1, hw)
    }
    return packed, output_size


# ------------------------------ wrapper --------------------------------------
@functools.partial(jax.jit, static_argnames=("output_size", "batch_tile"))
def ppo_actor_critic_forward(x, packed, *, output_size, batch_tile=2048):
    """x: (B, input_size). Returns (probs (B,out), value (B,1), nan_flag (B,))."""
    B, in_dim = x.shape
    head_width = packed["wh"].shape[1]

    # Stream activations in bf16 (MXU consumes bf16 anyway) -> halves the only
    # per-row input DMA; fuses with the padding copy below.
    x = x.astype(jnp.bfloat16)

    # Batch tiling: large tiles (default 2048 rows) to amortize per-step
    # overhead; grid length kept even when possible so v7x's two TensorCores
    # both get work via the "parallel" axis.
    b_pad8 = _round_up(B, 8)
    if b_pad8 <= 8:
        n_blocks, tb = 1, b_pad8
    else:
        n_blocks = _round_up(max(2, _cdiv(b_pad8, batch_tile)), 2)
        tb = _round_up(_cdiv(b_pad8, n_blocks), 8)
    b_pad = n_blocks * tb
    if b_pad != B:
        x = jnp.pad(x, ((0, b_pad - B), (0, 0)))

    def resident(arr):  # full array, same block every grid step -> no re-DMA
        return pl.BlockSpec(arr.shape, lambda i: (0, 0))

    out = pl.pallas_call(
        functools.partial(_ppo_kernel, output_size=output_size),
        out_shape=jax.ShapeDtypeStruct((b_pad, head_width), jnp.float32),
        grid_spec=pltpu.PrefetchScalarGridSpec(
            num_scalar_prefetch=0,
            grid=(n_blocks,),
            in_specs=[
                pl.BlockSpec((tb, in_dim), lambda i: (i, 0)),
                resident(packed["w1"]),
                resident(packed["aux1"]),
                resident(packed["w2"]),
                resident(packed["aux2"]),
                resident(packed["wh"]),
                resident(packed["bh"]),
            ],
            out_specs=pl.BlockSpec((tb, head_width), lambda i: (i, 0)),
        ),
        compiler_params=pltpu.CompilerParams(
            dimension_semantics=("parallel",)),
    )(x, packed["w1"], packed["aux1"], packed["w2"], packed["aux2"],
      packed["wh"], packed["bh"])

    probs = out[:B, :output_size]
    value = out[:B, output_size:output_size + 1]
    nan_flag = out[:B, output_size + 1] > 0.0
    return probs, value, nan_flag


# ------------------------- deterministic parameter init ----------------------
def _orthogonal(key, shape, gain):
    """Mimics nn.init.orthogonal_: QR of a gaussian, sign-fixed, scaled by gain."""
    rows, cols = shape
    a_shape = (rows, cols) if rows >= cols else (cols, rows)
    a = jax.random.normal(key, a_shape, dtype=jnp.float32)
    q, r = jnp.linalg.qr(a)
    q = q * jnp.sign(jnp.diagonal(r))[None, :]
    if rows < cols:
        q = q.T
    return (gain * q).astype(jnp.float32)


def init_params(key, input_size, output_size):
    k1, k2, ka, kc = jax.random.split(key, 4)
    sqrt2 = float(jnp.sqrt(2.0))
    return {
        "w1": _orthogonal(k1, (256, input_size), sqrt2),
        "b1": jnp.zeros((256,), jnp.float32),
        "g1": jnp.ones((256,), jnp.float32),
        "beta1": jnp.zeros((256,), jnp.float32),
        "w2": _orthogonal(k2, (128, 256), sqrt2),
        "b2": jnp.zeros((128,), jnp.float32),
        "g2": jnp.ones((128,), jnp.float32),
        "beta2": jnp.zeros((128,), jnp.float32),
        "wa": _orthogonal(ka, (output_size, 128), 0.01),
        "ba": jnp.zeros((output_size,), jnp.float32),
        "wc": _orthogonal(kc, (1, 128), 1.0),
        "bc": jnp.zeros((1,), jnp.float32),
    }


# ------------------------------- reference -----------------------------------
def _reference(x, p):
    """Pure-JAX reference mirroring the kernel's bf16-operand / f32-accum dots.
    (Numerical deviation from the f32 PyTorch model: ~bf16 input rounding.)"""
    bf16 = jnp.bfloat16

    def dot(a, w_t):
        return jnp.dot(a.astype(bf16), w_t.astype(bf16),
                       preferred_element_type=jnp.float32)

    def ln(h, g, b, eps=1e-5):
        mu = jnp.mean(h, -1, keepdims=True)
        var = jnp.mean((h - mu) ** 2, -1, keepdims=True)
        return (h - mu) * jax.lax.rsqrt(var + eps) * g + b

    h = jnp.maximum(ln(dot(x, p["w1"].T) + p["b1"], p["g1"], p["beta1"]), 0.0)
    h = jnp.maximum(ln(dot(h, p["w2"].T) + p["b2"], p["g2"], p["beta2"]), 0.0)
    logits = dot(h, p["wa"].T) + p["ba"]
    probs = jax.nn.softmax(logits, axis=-1)
    value = dot(h, p["wc"].T) + p["bc"]
    return probs, value


# --------------------------------- main ---------------------------------------
if __name__ == "__main__":
    key = jax.random.PRNGKey(0)
    k_params, k_x = jax.random.split(key)

    batch = 8          # small, but fills the 8 f32 sublanes
    input_size = 32
    output_size = 8

    params = init_params(k_params, input_size, output_size)
    packed, out_size = pack_params(params)
    x = jax.random.normal(k_x, (batch, input_size), dtype=jnp.float32)

    probs, value, nan_flag = ppo_actor_critic_forward(
        x, packed, output_size=out_size)
    jax.block_until_ready((probs, value, nan_flag))

    # Mirrors the PyTorch `if torch.isnan(logits).any(): raise RuntimeError`.
    if bool(jnp.any(nan_flag)):
        raise RuntimeError("NaN in model output")

    probs_ref, value_ref = _reference(x, params)
    assert probs.shape == (batch, output_size)
    assert value.shape == (batch, 1)
    assert jnp.allclose(probs, probs_ref, atol=1e-3, rtol=1e-3)
    assert jnp.allclose(value, value_ref, atol=1e-3, rtol=1e-3)
    assert jnp.allclose(jnp.sum(probs, axis=-1), 1.0, atol=1e-5)

    print("KERNEL_OK")
</pallas_src>

<mosaic_0001>
module attributes {stable_mosaic.version = 11 : i64} {
  func.func @_ppo_kernel(%arg0: i32, %arg1: memref<8x32xbf16, #tpu.memory_space<vmem>>, %arg2: memref<32x256xbf16, #tpu.memory_space<vmem>>, %arg3: memref<3x256xf32, #tpu.memory_space<vmem>>, %arg4: memref<256x128xbf16, #tpu.memory_space<vmem>>, %arg5: memref<3x128xf32, #tpu.memory_space<vmem>>, %arg6: memref<128x128xbf16, #tpu.memory_space<vmem>>, %arg7: memref<1x128xf32, #tpu.memory_space<vmem>>, %arg8: memref<8x128xf32, #tpu.memory_space<vmem>>) attributes {dimension_semantics = [#tpu.dimension_semantics<parallel>], iteration_bounds = array<i64: 1>, scalar_prefetch = 0 : i64, scratch_operands = 0 : i64, tpu.core_type = #tpu.core_type<tc>, window_params = [{transform_indices = @transform_0, window_bounds = array<i64: 8, 32>}, {pipeline_mode = #tpu.pipeline_mode<synchronous>, transform_indices = @transform_1, window_bounds = array<i64: 32, 256>}, {pipeline_mode = #tpu.pipeline_mode<synchronous>, transform_indices = @transform_2, window_bounds = array<i64: 3, 256>}, {pipeline_mode = #tpu.pipeline_mode<synchronous>, transform_indices = @transform_3, window_bounds = array<i64: 256, 128>}, {pipeline_mode = #tpu.pipeline_mode<synchronous>, transform_indices = @transform_4, window_bounds = array<i64: 3, 128>}, {pipeline_mode = #tpu.pipeline_mode<synchronous>, transform_indices = @transform_5, window_bounds = array<i64: 128, 128>}, {pipeline_mode = #tpu.pipeline_mode<synchronous>, transform_indices = @transform_6, window_bounds = array<i64: 1, 128>}, {transform_indices = @transform_7, window_bounds = array<i64: 8, 128>}]} {
    %c0 = arith.constant 0 : index
    %c0_0 = arith.constant 0 : index
    %0 = vector.load %arg1[%c0, %c0_0] : memref<8x32xbf16, #tpu.memory_space<vmem>>, vector<8x32xbf16>
    %c0_1 = arith.constant 0 : index
    %c0_2 = arith.constant 0 : index
    %1 = vector.load %arg3[%c0_1, %c0_2] : memref<3x256xf32, #tpu.memory_space<vmem>>, vector<1x256xf32>
    %c1 = arith.constant 1 : index
    %c0_3 = arith.constant 0 : index
    %2 = vector.load %arg3[%c1, %c0_3] : memref<3x256xf32, #tpu.memory_space<vmem>>, vector<1x256xf32>
    %c2 = arith.constant 2 : index
    %c0_4 = arith.constant 0 : index
    %3 = vector.load %arg3[%c2, %c0_4] : memref<3x256xf32, #tpu.memory_space<vmem>>, vector<1x256xf32>
    %c0_5 = arith.constant 0 : index
    %c0_6 = arith.constant 0 : index
    %4 = vector.load %arg2[%c0_5, %c0_6] : memref<32x256xbf16, #tpu.memory_space<vmem>>, vector<32x256xbf16>
    %cst = arith.constant dense<0.000000e+00> : vector<8x256xf32>
    %5 = tpu.matmul %0, %4, %cst {dimension_numbers = #tpu.dot_dimension_numbers<[1], [0], [0], [1], [0, 0, 1, 1], [], []>} : vector<8x32xbf16>, vector<32x256xbf16>, vector<8x256xf32> -> vector<8x256xf32>
    %6 = vector.broadcast %1 : vector<1x256xf32> to vector<8x256xf32>
    %7 = arith.addf %5, %6 : vector<8x256xf32>
    %cst_7 = arith.constant dense<0.000000e+00> : vector<8xf32>
    %8 = vector.multi_reduction <add>, %7, %cst_7 [1] : vector<8x256xf32> to vector<8xf32>
    %9 = vector.shape_cast %8 : vector<8xf32> to vector<8x1xf32>
    %10 = arith.mulf %7, %7 : vector<8x256xf32>
    %cst_8 = arith.constant dense<0.000000e+00> : vector<8xf32>
    %11 = vector.multi_reduction <add>, %10, %cst_8 [1] : vector<8x256xf32> to vector<8xf32>
    %12 = vector.shape_cast %11 : vector<8xf32> to vector<8x1xf32>
    %cst_9 = arith.constant 3.906250e-03 : f32
    %13 = vector.broadcast %cst_9 : f32 to vector<8x1xf32>
    %14 = arith.mulf %9, %13 : vector<8x1xf32>
    %cst_10 = arith.constant 3.906250e-03 : f32
    %15 = vector.broadcast %cst_10 : f32 to vector<8x1xf32>
    %16 = arith.mulf %12, %15 : vector<8x1xf32>
    %17 = arith.mulf %14, %14 : vector<8x1xf32>
    %18 = arith.subf %16, %17 : vector<8x1xf32>
    %cst_11 = arith.constant 0.000000e+00 : f32
    %19 = vector.broadcast %cst_11 : f32 to vector<8x1xf32>
    %20 = arith.maximumf %18, %19 : vector<8x1xf32>
    %21 = vector.broadcast %14 : vector<8x1xf32> to vector<8x256xf32>
    %22 = arith.subf %7, %21 : vector<8x256xf32>
    %cst_12 = arith.constant 9.99999974E-6 : f32
    %23 = vector.broadcast %cst_12 : f32 to vector<8x1xf32>
    %24 = arith.addf %20, %23 : vector<8x1xf32>
    %25 = math.rsqrt %24 : vector<8x1xf32>
    %26 = vector.broadcast %25 : vector<8x1xf32> to vector<8x256xf32>
    %27 = arith.mulf %22, %26 : vector<8x256xf32>
    %28 = vector.broadcast %2 : vector<1x256xf32> to vector<8x256xf32>
    %29 = arith.mulf %27, %28 : vector<8x256xf32>
    %30 = vector.broadcast %3 : vector<1x256xf32> to vector<8x256xf32>
    %31 = arith.addf %29, %30 : vector<8x256xf32>
    %cst_13 = arith.constant 0.000000e+00 : f32
    %32 = vector.broadcast %cst_13 : f32 to vector<8x256xf32>
    %33 = arith.maximumf %31, %32 : vector<8x256xf32>
    %c0_14 = arith.constant 0 : index
    %c0_15 = arith.constant 0 : index
    %34 = vector.load %arg5[%c0_14, %c0_15] : memref<3x128xf32, #tpu.memory_space<vmem>>, vector<1x128xf32>
    %c1_16 = arith.constant 1 : index
    %c0_17 = arith.constant 0 : index
    %35 = vector.load %arg5[%c1_16, %c0_17] : memref<3x128xf32, #tpu.memory_space<vmem>>, vector<1x128xf32>
    %c2_18 = arith.constant 2 : index
    %c0_19 = arith.constant 0 : index
    %36 = vector.load %arg5[%c2_18, %c0_19] : memref<3x128xf32, #tpu.memory_space<vmem>>, vector<1x128xf32>
    %37 = arith.truncf %33 : vector<8x256xf32> to vector<8x256xbf16>
    %c0_20 = arith.constant 0 : index
    %c0_21 = arith.constant 0 : index
    %38 = vector.load %arg4[%c0_20, %c0_21] : memref<256x128xbf16, #tpu.memory_space<vmem>>, vector<256x128xbf16>
    %cst_22 = arith.constant dense<0.000000e+00> : vector<8x128xf32>
    %39 = tpu.matmul %37, %38, %cst_22 {dimension_numbers = #tpu.dot_dimension_numbers<[1], [0], [0], [1], [0, 0, 1, 1], [], []>} : vector<8x256xbf16>, vector<256x128xbf16>, vector<8x128xf32> -> vector<8x128xf32>
    %40 = vector.broadcast %34 : vector<1x128xf32> to vector<8x128xf32>
    %41 = arith.addf %39, %40 : vector<8x128xf32>
    %cst_23 = arith.constant dense<0.000000e+00> : vector<8xf32>
    %42 = vector.multi_reduction <add>, %41, %cst_23 [1] : vector<8x128xf32> to vector<8xf32>
    %43 = vector.shape_cast %42 : vector<8xf32> to vector<8x1xf32>
    %44 = arith.mulf %41, %41 : vector<8x128xf32>
    %cst_24 = arith.constant dense<0.000000e+00> : vector<8xf32>
    %45 = vector.multi_reduction <add>, %44, %cst_24 [1] : vector<8x128xf32> to vector<8xf32>
    %46 = vector.shape_cast %45 : vector<8xf32> to vector<8x1xf32>
    %cst_25 = arith.constant 7.812500e-03 : f32
    %47 = vector.broadcast %cst_25 : f32 to vector<8x1xf32>
    %48 = arith.mulf %43, %47 : vector<8x1xf32>
    %cst_26 = arith.constant 7.812500e-03 : f32
    %49 = vector.broadcast %cst_26 : f32 to vector<8x1xf32>
    %50 = arith.mulf %46, %49 : vector<8x1xf32>
    %51 = arith.mulf %48, %48 : vector<8x1xf32>
    %52 = arith.subf %50, %51 : vector<8x1xf32>
    %cst_27 = arith.constant 0.000000e+00 : f32
    %53 = vector.broadcast %cst_27 : f32 to vector<8x1xf32>
    %54 = arith.maximumf %52, %53 : vector<8x1xf32>
    %55 = vector.broadcast %48 : vector<8x1xf32> to vector<8x128xf32>
    %56 = arith.subf %41, %55 : vector<8x128xf32>
    %cst_28 = arith.constant 9.99999974E-6 : f32
    %57 = vector.broadcast %cst_28 : f32 to vector<8x1xf32>
    %58 = arith.addf %54, %57 : vector<8x1xf32>
    %59 = math.rsqrt %58 : vector<8x1xf32>
    %60 = vector.broadcast %59 : vector<8x1xf32> to vector<8x128xf32>
    %61 = arith.mulf %56, %60 : vector<8x128xf32>
    %62 = vector.broadcast %35 : vector<1x128xf32> to vector<8x128xf32>
    %63 = arith.mulf %61, %62 : vector<8x128xf32>
    %64 = vector.broadcast %36 : vector<1x128xf32> to vector<8x128xf32>
    %65 = arith.addf %63, %64 : vector<8x128xf32>
    %cst_29 = arith.constant 0.000000e+00 : f32
    %66 = vector.broadcast %cst_29 : f32 to vector<8x128xf32>
    %67 = arith.maximumf %65, %66 : vector<8x128xf32>
    %68 = arith.truncf %67 : vector<8x128xf32> to vector<8x128xbf16>
    %c0_30 = arith.constant 0 : index
    %c0_31 = arith.constant 0 : index
    %69 = vector.load %arg6[%c0_30, %c0_31] : memref<128x128xbf16, #tpu.memory_space<vmem>>, vector<128x128xbf16>
    %cst_32 = arith.constant dense<0.000000e+00> : vector<8x128xf32>
    %70 = tpu.matmul %68, %69, %cst_32 {dimension_numbers = #tpu.dot_dimension_numbers<[1], [0], [0], [1], [0, 0, 1, 1], [], []>} : vector<8x128xbf16>, vector<128x128xbf16>, vector<8x128xf32> -> vector<8x128xf32>
    %c0_33 = arith.constant 0 : index
    %c0_34 = arith.constant 0 : index
    %71 = vector.load %arg7[%c0_33, %c0_34] : memref<1x128xf32, #tpu.memory_space<vmem>>, vector<1x128xf32>
    %72 = vector.broadcast %71 : vector<1x128xf32> to vector<8x128xf32>
    %73 = arith.addf %70, %72 : vector<8x128xf32>
    %74 = tpu.iota {dimensions = array<i32: 1>} : vector<8x128xi32>
    %c8_i32 = arith.constant 8 : i32
    %75 = vector.broadcast %c8_i32 : i32 to vector<8x128xi32>
    %76 = arith.cmpi slt, %74, %75 : vector<8x128xi32>
    %cst_35 = arith.constant 0xFF800000 : f32
    %77 = vector.broadcast %cst_35 : f32 to vector<8x128xf32>
    %78 = arith.select %76, %73, %77 : vector<8x128xi1>, vector<8x128xf32>
    %79 = arith.cmpf one, %78, %78 : vector<8x128xf32>
    %cst_36 = arith.constant 1.000000e+00 : f32
    %cst_37 = arith.constant 0.000000e+00 : f32
    %80 = vector.broadcast %cst_36 : f32 to vector<8x128xf32>
    %81 = vector.broadcast %cst_37 : f32 to vector<8x128xf32>
    %82 = arith.select %79, %80, %81 : vector<8x128xi1>, vector<8x128xf32>
    %cst_38 = arith.constant dense<0xFF800000> : vector<8xf32>
    %83 = vector.multi_reduction <maximumf>, %82, %cst_38 [1] : vector<8x128xf32> to vector<8xf32>
    %84 = vector.shape_cast %83 : vector<8xf32> to vector<8x1xf32>
    %cst_39 = arith.constant dense<0xFF800000> : vector<8xf32>
    %85 = vector.multi_reduction <maximumf>, %78, %cst_39 [1] : vector<8x128xf32> to vector<8xf32>
    %86 = vector.shape_cast %85 : vector<8xf32> to vector<8x1xf32>
    %87 = vector.broadcast %86 : vector<8x1xf32> to vector<8x128xf32>
    %88 = arith.subf %78, %87 : vector<8x128xf32>
    %89 = math.exp %88 : vector<8x128xf32>
    %cst_40 = arith.constant dense<0.000000e+00> : vector<8xf32>
    %90 = vector.multi_reduction <add>, %89, %cst_40 [1] : vector<8x128xf32> to vector<8xf32>
    %91 = vector.shape_cast %90 : vector<8xf32> to vector<8x1xf32>
    %92 = tpu.reciprocal %91 {approx = true} : vector<8x1xf32> -> vector<8x1xf32>
    %93 = arith.mulf %91, %92 : vector<8x1xf32>
    %cst_41 = arith.constant 2.000000e+00 : f32
    %94 = vector.broadcast %cst_41 : f32 to vector<8x1xf32>
    %95 = arith.subf %94, %93 : vector<8x1xf32>
    %96 = arith.mulf %92, %95 : vector<8x1xf32>
    %97 = vector.broadcast %96 : vector<8x1xf32> to vector<8x128xf32>
    %98 = arith.mulf %89, %97 : vector<8x128xf32>
    %c8_i32_42 = arith.constant 8 : i32
    %99 = vector.broadcast %c8_i32_42 : i32 to vector<8x128xi32>
    %100 = arith.cmpi eq, %74, %99 : vector<8x128xi32>
    %101 = arith.select %100, %73, %98 : vector<8x128xi1>, vector<8x128xf32>
    %c9_i32 = arith.constant 9 : i32
    %102 = vector.broadcast %c9_i32 : i32 to vector<8x128xi32>
    %103 = arith.cmpi eq, %74, %102 : vector<8x128xi32>
    %104 = vector.shape_cast %84 : vector<8x1xf32> to vector<8x1xf32>
    %105 = vector.broadcast %104 : vector<8x1xf32> to vector<8x128xf32>
    %106 = arith.select %103, %105, %101 : vector<8x128xi1>, vector<8x128xf32>
    %c0_43 = arith.constant 0 : index
    %c0_44 = arith.constant 0 : index
    %107 = vector.load %arg8[%c0_43, %c0_44] : memref<8x128xf32, #tpu.memory_space<vmem>>, vector<8x128xf32>
    tpu.vector_store %arg8[%c0_43, %c0_44], %106 {strides = array<i32>} : memref<8x128xf32, #tpu.memory_space<vmem>>, vector<8x128xf32>,
    return
  }
  func.func @transform_0(%arg0: i32) -> (i32, i32) {
    %c0_i32 = arith.constant 0 : i32
    %c0_i32_0 = arith.constant 0 : i32
    return %arg0, %c0_i32 : i32, i32
  }
  func.func @transform_1(%arg0: i32) -> (i32, i32) {
    %c0_i32 = arith.constant 0 : i32
    %c0_i32_0 = arith.constant 0 : i32
    %c0_i32_1 = arith.constant 0 : i32
    return %c0_i32, %c0_i32_0 : i32, i32
  }
  func.func @transform_2(%arg0: i32) -> (i32, i32) {
    %c0_i32 = arith.constant 0 : i32
    %c0_i32_0 = arith.constant 0 : i32
    %c0_i32_1 = arith.constant 0 : i32
    return %c0_i32, %c0_i32_0 : i32, i32
  }
  func.func @transform_3(%arg0: i32) -> (i32, i32) {
    %c0_i32 = arith.constant 0 : i32
    %c0_i32_0 = arith.constant 0 : i32
    %c0_i32_1 = arith.constant 0 : i32
    return %c0_i32, %c0_i32_0 : i32, i32
  }
  func.func @transform_4(%arg0: i32) -> (i32, i32) {
    %c0_i32 = arith.constant 0 : i32
    %c0_i32_0 = arith.constant 0 : i32
    %c0_i32_1 = arith.constant 0 : i32
    return %c0_i32, %c0_i32_0 : i32, i32
  }
  func.func @transform_5(%arg0: i32) -> (i32, i32) {
    %c0_i32 = arith.constant 0 : i32
    %c0_i32_0 = arith.constant 0 : i32
    %c0_i32_1 = arith.constant 0 : i32
    return %c0_i32, %c0_i32_0 : i32, i32
  }
  func.func @transform_6(%arg0: i32) -> (i32, i32) {
    %c0_i32 = arith.constant 0 : i32
    %c0_i32_0 = arith.constant 0 : i32
    %c0_i32_1 = arith.constant 0 : i32
    return %c0_i32, %c0_i32_0 : i32, i32
  }
  func.func @transform_7(%arg0: i32) -> (i32, i32) {
    %c0_i32 = arith.constant 0 : i32
    %c0_i32_0 = arith.constant 0 : i32
    return %arg0, %c0_i32 : i32, i32
  }
}

</mosaic_0001>

<bundles_post_ra>
// kernel: ppo_actor_critic_forward.1
= control target key start
LH: loop header
LB: loop body
LE: loop exit
PB: predicated region body
PF: predicated region fallthrough
CT: control target
= control target key end

     0   :  { %12 = vsyncpa [#allocation3], 0  ;;  %s842_s0 = inlined_call_operand.vmem [shape: bf16[8,32], index: 0, kind: input, shape index: {}]   ;;  %s843_s1 = inlined_call_operand.hbm [shape: bf16[32,256], index: 1, kind: input, shape index: {}]   ;;  %s844_s2 = inlined_call_operand.vmem [shape: f32[3,256], index: 2, kind: input, shape index: {}]   ;;  %s845_s3 = inlined_call_operand.hbm [shape: bf16[256,128], index: 3, kind: input, shape index: {}]   ;;  %s846_s4 = inlined_call_operand.vmem [shape: f32[3,128], index: 4, kind: input, shape index: {}]   ;;  %s847_s5 = inlined_call_operand.hbm [shape: bf16[128,128], index: 5, kind: input, shape index: {}]   ;;  %s848_s6 = inlined_call_operand.vmem [shape: f32[1,128], index: 6, kind: input, shape index: {}]   ;;  %s849_s7 = inlined_call_operand.vmem [shape: f32[8,128], index: 7, kind: output, shape index: {}]  }
   0x1   :  { %13 = vsyncpa [#allocation5], 0  ;;  %s744_s24 = smov [#allocation4]  }
   0x2   :  { %s35_s25 = sshll.u32 %s744_s24, 4  ;;  %s36_s25 = int_to_ptr.vmem [resolvable:$true] %s35_s25 }
   0x3   :  { %s688_s26 = scalar_lea.vmem %s36_s25, 2048  ;;  %p693_p1 = scmp.lt.s32.totalorder %s36_s25, %s36_s25 }
   0x4   :  { %p689_p0 = scmp.ne.s32.totalorder %s36_s25, %s688_s26  ;;  %p694_p2 = scmp.lt.s32.totalorder %s688_s26, %s688_s26 }
   0x6   :  { %p695_p3 = por %p694_p2, %p693_p1 }
   0x8   :  { %p696_p4 = pnand %p695_p3, %p689_p0 }
   0xa   :  { %699 = shalt.err (!%p696_p4)
}
   0xb   :  { %s745_s27 = smov 64   ;;  %s746_s28 = smov 4  }
   0xc   :  { %41 = dma.hbm_to_vmem [thread:$0]  %s845_s3, 2048, %s36_s25, [#allocation5], %s745_s27, %s745_s27, %s746_s28  }
   0xd   :  { %s747_s8 = smov [#allocation2]  }
   0xe   :  { %s21_s9 = sshll.u32 %s747_s8, 4  ;;  %s22_s9 = int_to_ptr.vmem [resolvable:$true] %s21_s9 }
   0xf   :  { %s708_s10 = scalar_lea.vmem %s22_s9, 512  ;;  %p713_p6 = scmp.lt.s32.totalorder %s22_s9, %s22_s9 }
  0x10   :  { %p709_p5 = scmp.ne.s32.totalorder %s22_s9, %s708_s10  ;;  %p714_p7 = scmp.lt.s32.totalorder %s708_s10, %s708_s10 }
  0x12   :  { %p715_p8 = por %p714_p7, %p713_p6 }
  0x14   :  { %p716_p9 = pnand %p715_p8, %p709_p5 }
  0x16   :  { %719 = shalt.err (!%p716_p9)
}
  0x17   :  { %s748_s11 = smov 128   ;;  %s749_s12 = smov 8  }
  0x18   :  { %27 = dma.hbm_to_vmem [thread:$0]  %s843_s1, 512, %s22_s9, [#allocation3], %s748_s11, %s748_s11, %s749_s12  }
  0x19   :  { %s750_s15 = smov [#allocation6]  }
  0x1a   :  { %s49_s16 = sshll.u32 %s750_s15, 4  ;;  %s50_s16 = int_to_ptr.vmem [resolvable:$true] %s49_s16 }
  0x1b   :  { %s728_s3 = scalar_lea.vmem %s50_s16, 1024  ;;  %p733_p11 = scmp.lt.s32.totalorder %s50_s16, %s50_s16 }
  0x1c   :  { %p729_p10 = scmp.ne.s32.totalorder %s50_s16, %s728_s3  ;;  %p734_p12 = scmp.lt.s32.totalorder %s728_s3, %s728_s3 }
  0x1e   :  { %p735_p13 = por %p734_p12, %p733_p11 }
  0x20   :  { %p736_p0 = pnand %p735_p13, %p729_p10 }
  0x22   :  { %739 = shalt.err (!%p736_p0)
}
  0x23   :  { %55 = dma.hbm_to_vmem [thread:$0]  %s847_s5, 1024, %s50_s16, [#allocation5], %s745_s27, %s745_s27, %s746_s28  }
  0x24   :  { %740 = dma.done.wait [#allocation3], 512  }
  0x25   :  { %741 = vsyncadd [#allocation3], 4294966784 }
  0x26   :  { %742 = dma.done.wait [#allocation5], 3072  }
  0x27   :  { %743 = vsyncadd [#allocation5], 4294964224  ;;  %v751_v0 = vmov 0   ;;  %v642_v1 = vld [vmem:[#allocation2 + $0x14] ss:$8 sps:$4 sm:$0xff]   ;;  %vm109_vm0 = vcmask 261120   ;;  %v79_v6 = vlaneseq }
  0x28   :  { %145 = vmatprep.mubr.bf16.mxu0 %v751_v0  ;;  %v644_v2 = vld [vmem:[#allocation2 + $0x10] ss:$8 sps:$4 sm:$0xff]   ;;  %125 = vmatprep.subr.bf16.mxu0 %v642_v1  ;;  %v645_v3 = vld [vmem:[#allocation2 + $0x4] ss:$8 sps:$4 sm:$0xff]   ;;  %v647_v4 = vld [vmem:[#allocation2] ss:$8 sps:$4 sm:$0xff]  }
  0x29   :  { %126 = vmatpush1.bf16.msra.mxu0 %v644_v2  ;;  %v68_v5 = vld [vmem:[%s842_s0] sm:$0xf]  ;;  %v80_v7 = vshrl.u32 %v79_v6, 7  ;;  %v648_v23 = vld [vmem:[#allocation4 + $0x78] sm:$0xff]   ;;  %v650_v25 = vld [vmem:[#allocation4 + $0x70] sm:$0xff]   ;;  %vm753_vm1 = vmmov 0  }
  0x2a   :  { %127 = vmatprep.subr.bf16.mxu0 %v645_v3  ;;  %v69_v10 = vld [vmem:[%s844_s2] ss:$4 sm:$0x3]  ;;  %v649_v24 = vld [vmem:[#allocation4 + $0x38] sm:$0xff]   ;;  %581 = vmatprep.subr.bf16.mxu1 %v648_v23  ;;  %v651_v26 = vld [vmem:[#allocation4 + $0x30] sm:$0xff]  }
  0x2b   :  { %v807_v8 = vsub.s32 0, %v80_v7  ;;  %v809_v9 = vsub.s32 1, %v80_v7  ;;  %582 = vmatpush3.bf16.msra.mxu1 %v649_v24  ;;  %v652_v27 = vld [vmem:[#allocation4 + $0x68] sm:$0xff]   ;;  %v654_v29 = vld [vmem:[#allocation4 + $0x60] sm:$0xff]   ;;  %v656_v31 = vld [vmem:[#allocation4 + $0x58] sm:$0xff]  }
  0x2c   :  { %583 = vmatprep.subr.bf16.mxu1 %v650_v25  ;;  %v653_v28 = vld [vmem:[#allocation4 + $0x28] sm:$0xff]   ;;  %v655_v30 = vld [vmem:[#allocation4 + $0x20] sm:$0xff]   ;;  %v657_v32 = vld [vmem:[#allocation4 + $0x18] sm:$0xff]  }
  0x2d   :  { %128 = vmatpush1.bf16.msra.mxu0 %v647_v4  ;;  %v82_v11 = vrot.slane %v69_v10, %v807_v8  ;;  %v86_v12 = vrot.slane %v69_v10, %v809_v9  ;;  %v658_v33 = vld [vmem:[#allocation4 + $0x50] sm:$0xff]   ;;  %v660_v35 = vld [vmem:[#allocation4 + $0x48] sm:$0xff]   ;;  %v662_v37 = vld [vmem:[#allocation4 + $0x40] sm:$0xff]  }
  0x2e   :  { %v659_v34 = vld [vmem:[#allocation4 + $0x10] sm:$0xff]   ;;  %v661_v36 = vld [vmem:[#allocation4 + $0x8] sm:$0xff]   ;;  %v663_v38 = vld [vmem:[#allocation4] sm:$0xff]  }
  0x2f   :  { %584 = vmatpush3.bf16.msra.mxu1 %v651_v26  ;;  %v546_v47 = vld [vmem:[%s844_s2 + $0x1] ss:$4 sm:$0x3]  ;;  %v547_v48 = vld [vmem:[%s844_s2 + $0x2] ss:$4 sm:$0x3] }
  0x30   :  { %552 = vmatmul.mubr.msk.bf16.vlgmr.msra.gmra.mxu0 %vm109_vm0, %v68_v5  ;;  %585 = vmatprep.subr.bf16.mxu1 %v652_v27  ;;  %v177_v51 = vrot.slane %v546_v47, %v807_v8  ;;  %v181_v52 = vrot.slane %v546_v47, %v809_v9  ;;  %v190_v55 = vrot.slane %v547_v48, %v807_v8  ;;  %v553_v3 = vld [vmem:[%s846_s4] ss:$0 sm:$0xff] }
  0x31   :  { %v194_v56 = vrot.slane %v547_v48, %v809_v9 }
  0x33   :  { %586 = vmatpush3.bf16.msra.mxu1 %v653_v28 }
  0x34   :  { %587 = vmatprep.subr.bf16.mxu1 %v654_v29 }
  0x37   :  { %588 = vmatpush3.bf16.msra.mxu1 %v655_v30  ;;  %v570_v30 = vld [vmem:[%s846_s4 + $0x1] ss:$0 sm:$0xff] }
  0x38   :  { %589 = vmatprep.subr.bf16.mxu1 %v656_v31 }
  0x3b   :  { %590 = vmatpush3.bf16.msra.mxu1 %v657_v32  ;;  %v571_v32 = vld [vmem:[%s846_s4 + $0x2] ss:$0 sm:$0xff] }
  0x3c   :  { %591 = vmatprep.subr.bf16.mxu1 %v658_v33 }
  0x3f   :  { %592 = vmatpush3.bf16.msra.mxu1 %v659_v34 }
  0x40   :  { %593 = vmatprep.subr.bf16.mxu1 %v660_v35 }
  0x43   :  { %594 = vmatpush3.bf16.msra.mxu1 %v661_v36 }
  0x44   :  { %595 = vmatprep.subr.bf16.mxu1 %v662_v37  ;;  %v516_v37 = vand.u32 127, %v79_v6 }
  0x46   :  { %vm517_vm2 = vcmp.lt.s32.totalorder %v516_v37, 8  ;;  %vm535_vm4 = vcmp.eq.s32.totalorder %v516_v37, 8  ;;  %vm537_vm5 = vcmp.eq.s32.totalorder %v516_v37, 9 }
  0x47   :  { %596 = vmatpush3.bf16.msra.mxu1 %v663_v38  ;;  %v572_v38 = vld [vmem:[%s848_s6] ss:$0 sm:$0xff] }
  0xf0   :  { %v147_v13 = vpop.f32.mrf.mxu0 }
  0xf1   :  { %v148_v15 = vadd.f32 %v147_v13, %v82_v11  ;;  %v664_v11 = vld [vmem:[#allocation6 + $0x38] sm:$0xff]   ;;  %v665_v13 = vld [vmem:[#allocation6 + $0x30] sm:$0xff]  }
  0xf2   :  { %v149_v14 = vpop.f32.mrf.mxu0 }
  0xf3   :  { %v150_v16 = vadd.f32 %v149_v14, %v86_v12  ;;  %v157_v21 = vmul.f32 %v148_v15, %v148_v15  ;;  %v752_v12 = vmov 0.0   ;;  %v666_v14 = vld [vmem:[#allocation6 + $0x28] sm:$0xff]  }
  0xf4   :  { %v151_v17 = vpop.f32.mrf.mxu0  ;;  %612 = vmatprep.subr.bf16.mxu0 %v752_v12  ;;  %628 = vmatprep.mubr.msk.bf16.mxu0 %vm753_vm1, %v752_v12 }
  0xf5   :  { %v154_v18 = vadd.f32 %v150_v16, %v148_v15  ;;  %v158_v19 = vmul.f32 %v150_v16, %v150_v16  ;;  %613 = vmatpush3.bf16.msra.mxu0 %v664_v11  ;;  %v669_v17 = vld [vmem:[#allocation6 + $0x10] sm:$0xff]  }
  0xf6   :  { %v152_v20 = vpop.f32.mrf.mxu0  ;;  %614 = vmatprep.subr.bf16.mxu0 %v752_v12 }
  0xf7   :  { %155 = vadd.xlane.f32.xlu0 %v154_v18  ;;  %v159_v22 = vadd.f32 %v158_v19, %v157_v21  ;;  %v670_v18 = vld [vmem:[#allocation6 + $0x8] sm:$0xff]   ;;  %v671_v19 = vld [vmem:[#allocation6] sm:$0xff]  }
  0xf9   :  { %615 = vmatpush3.bf16.msra.mxu0 %v665_v13 }
  0xfa   :  { %616 = vmatprep.subr.bf16.mxu0 %v752_v12 }
  0xfb   :  { %160 = vadd.xlane.f32.xlu0 %v159_v22 }
  0xfd   :  { %617 = vmatpush3.bf16.msra.mxu0 %v666_v14 }
  0xfe   :  { %618 = vmatprep.subr.bf16.mxu0 %v752_v12 }
 0x180   :  { %v156_v39 = vpop.xlane.xlu0 %155 }
 0x181   :  { %v162_v40 = vmul.f32 0.00390625, %v156_v39 }
 0x183   :  { %v164_v42 = vmul.f32 %v162_v40, %v162_v40  ;;  %v167_v49 = vsub.f32 %v148_v15, %v162_v40  ;;  %v168_v50 = vsub.f32 %v150_v16, %v162_v40  ;;  %v667_v15 = vld [vmem:[#allocation6 + $0x20] sm:$0xff]   ;;  %v668_v16 = vld [vmem:[#allocation6 + $0x18] sm:$0xff]  }
 0x184   :  { %v161_v41 = vpop.xlane.xlu0 %160  ;;  %619 = vmatpush3.bf16.msra.mxu0 %v667_v15 }
 0x185   :  { %v163_v43 = vmul.f32 0.00390625, %v161_v41  ;;  %620 = vmatprep.subr.bf16.mxu0 %v752_v12 }
 0x187   :  { %v165_v44 = vsub.f32 %v163_v43, %v164_v42 }
 0x188   :  { %621 = vmatpush3.bf16.msra.mxu0 %v668_v16 }
 0x189   :  { %v166_v45 = vmax.f32 %v165_v44, 0.0  ;;  %622 = vmatprep.subr.bf16.mxu0 %v752_v12 }
 0x18b   :  { %v169_v46 = vadd.f32 1e-05, %v166_v45 }
 0x18c   :  { %623 = vmatpush3.bf16.msra.mxu0 %v669_v17 }
 0x18d   :  { %672 = vrsqrt.f32 %v169_v46  ;;  %624 = vmatprep.subr.bf16.mxu0 %v752_v12 }
 0x190   :  { %625 = vmatpush3.bf16.msra.mxu0 %v670_v18 }
 0x191   :  { %626 = vmatprep.subr.bf16.mxu0 %v752_v12 }
 0x194   :  { %627 = vmatpush3.bf16.msra.mxu0 %v671_v19 }
 0x19a   :  { %v673_v53 = vpop.eup %672 }
 0x19b   :  { %v172_v54 = vmul.f32 %v673_v53, %v168_v50  ;;  %v171_v57 = vmul.f32 %v673_v53, %v167_v49 }
 0x19d   :  { %v185_v58 = vmul.f32 %v181_v52, %v172_v54  ;;  %v184_v59 = vmul.f32 %v177_v51, %v171_v57 }
 0x19f   :  { %v198_v60 = vadd.f32 %v194_v56, %v185_v58  ;;  %v197_v61 = vadd.f32 %v190_v55, %v184_v59 }
 0x1a1   :  { %v200_v62 = vmax.f32 %v198_v60, 0.0  ;;  %v199_v63 = vmax.f32 %v197_v61, 0.0 }
 0x1a3   :  { %v205_v0 = vpack.c.bf16 %v200_v62, %v200_v62  ;;  %v204_v1 = vpack.c.bf16 %v199_v63, %v199_v63 }
 0x1a5   :  { %370 = vmatprep.mubr.bf16.mxu1 %v205_v0 }
 0x1a6   :  { %371 = vmatmul.mubr.bf16.vlgmr.msra.gmra.mxu1 %v204_v1 }
 0x266   :  { %v597_v2 = vpop.f32.mrf.mxu1 }
 0x268   :  { %v598_v4 = vpop.f32.mrf.mxu1 }
 0x269   :  { %v599_v5 = vadd.f32 %v598_v4, %v597_v2 }
 0x26a   :  { %v600_v7 = vpop.f32.mrf.mxu1 }
 0x26b   :  { %v373_v8 = vadd.f32 %v599_v5, %v553_v3 }
 0x26c   :  { %v601_v9 = vpop.f32.mrf.mxu1 }
 0x26d   :  { %378 = vadd.xlane.f32.xlu1 %v373_v8  ;;  %v380_v10 = vmul.f32 %v373_v8, %v373_v8 }
 0x271   :  { %381 = vadd.xlane.f32.xlu1 %v380_v10 }
 0x2f6   :  { %v379_v20 = vpop.xlane.xlu1 %378 }
 0x2f7   :  { %v383_v21 = vmul.f32 0.0078125, %v379_v20 }
 0x2f9   :  { %v385_v23 = vmul.f32 %v383_v21, %v383_v21  ;;  %v388_v28 = vsub.f32 %v373_v8, %v383_v21 }
 0x2fa   :  { %v382_v22 = vpop.xlane.xlu1 %381 }
 0x2fb   :  { %v384_v24 = vmul.f32 0.0078125, %v382_v22 }
 0x2fd   :  { %v386_v25 = vsub.f32 %v384_v24, %v385_v23 }
 0x2ff   :  { %v387_v26 = vmax.f32 %v386_v25, 0.0 }
 0x301   :  { %v389_v27 = vadd.f32 1e-05, %v387_v26 }
 0x303   :  { %674 = vrsqrt.f32 %v389_v27 }
 0x310   :  { %v675_v29 = vpop.eup %674 }
 0x311   :  { %v391_v31 = vmul.f32 %v675_v29, %v388_v28 }
 0x313   :  { %v396_v33 = vmul.f32 %v570_v30, %v391_v31 }
 0x315   :  { %v401_v34 = vadd.f32 %v571_v32, %v396_v33 }
 0x317   :  { %v402_v35 = vmax.f32 %v401_v34, 0.0 }
 0x319   :  { %v403_v36 = vpack.c.bf16 %v402_v35, %v402_v35 }
 0x31b   :  { %629 = vmatmul.mubr.bf16.vlgmr.msra.gmra.mxu0 %v403_v36 }
 0x3db   :  { %v509_v39 = vpop.f32.mrf.mxu0 }
 0x3dc   :  { %v510_v40 = vadd.f32 %v572_v38, %v509_v39 }
 0x3dd   :  { %v630_v41 = vpop.f32.mrf.mxu0 }
 0x3de   :  { %v518_v42 = vsel %vm517_vm2, %v510_v40, -inf }
 0x3df   :  { %523 = vmax.xlane.f32.xlu0 %v518_v42  ;;  %v512_v43 = vpop.f32.mrf.mxu0  ;;  %vm519_vm3 = vcmp.ne.f32.partialorder %v518_v42, %v518_v42 }
 0x3e0   :  { %v520_v45 = vsel %vm519_vm3, 1.0, %v752_v12 }
 0x3e1   :  { %v631_v44 = vpop.f32.mrf.mxu0 }
 0x3e3   :  { %521 = vmax.xlane.f32.xlu0 %v520_v45 }
 0x468   :  { %v524_v46 = vpop.xlane.xlu0 %523 }
 0x469   :  { %v525_v47 = vsub.f32 %v518_v42, %v524_v46 }
 0x46b   :  { %v526_v48 = vmul.f32 1.442695, %v525_v47 }
 0x46c   :  { %v522_v55 = vpop.xlane.xlu0 %521 }
 0x46d   :  { %676 = vpow2.f32 %v526_v48 }
 0x47a   :  { %v677_v6 = vpop.eup %676 }
 0x47b   :  { %528 = vadd.xlane.f32.xlu1 %v677_v6 }
 0x504   :  { %v529_v49 = vpop.xlane.xlu1 %528 }
 0x505   :  { %678 = vrcp.f32 %v529_v49 }
 0x512   :  { %v679_v50 = vpop.eup %678 }
 0x513   :  { %v531_v51 = vmul.f32 %v679_v50, %v529_v49 }
 0x515   :  { %v532_v52 = vsub.f32 2.0, %v531_v51 }
 0x517   :  { %v533_v53 = vmul.f32 %v679_v50, %v532_v52 }
 0x519   :  { %v534_v54 = vmul.f32 %v677_v6, %v533_v53 }
 0x51b   :  { %v536_v56 = vsel %vm535_vm4, %v510_v40, %v534_v54 }
 0x51c   :  { %v538_v57 = vsel %vm537_vm5, %v522_v55, %v536_v56 }
 0x51d   :  { %539 = vst [vmem:[%s849_s7] sm:$0xff] %v538_v57 }
 0x51e   :  { %544 = vsyncpa [#allocation3], 1 }
 0x51f   :  { %545 = vsyncpa [#allocation5], 1 }

</bundles_post_ra>
